<compile_context>
chip_gen: v5e
topology: v5e:2x2
jax: 0.10.0
libtpu: 0.0.40
codegen_flags: <defaults>
</compile_context>

<pallas_src>
import math
from functools import partial

import jax
import jax.numpy as jnp
from jax.experimental import pallas as pl
from jax.experimental.pallas import tpu as pltpu


def timelinear_kernel(ksize,
                      x_ref, xm_ref,
                      w1_ref, b1_ref, g1_ref, be1_ref, gm1_ref,
                      w2_ref, b2_ref, g2_ref, be2_ref, gm2_ref,
                      wtcw_ref, mask_ref, w3_ref,
                      wh_ref, bias_ref,
                      out_ref):
    L = x_ref.shape[0]                    # seq_len
    cdt = w1_ref.dtype                    # MXU operand dtype (f32 or bf16)

    # ---------- instance statistics over the seq dim (torch.var unbiased) ----
    x = x_ref[...].astype(jnp.float32)                       # [L, bb*C]
    means = jnp.mean(x, axis=0, keepdims=True)                # [1, bb*C]
    var = jnp.sum((x - means) ** 2, axis=0, keepdims=True) * (1.0 / (L - 1))
    veps = var + 1e-5
    inv_std = jax.lax.rsqrt(veps)                             # EUP slot
    stdev = veps * inv_std                                    # sqrt via one mul
    xn = (x - means) * inv_std                                # [L, bb*C]

    def groupnorm(u, gm_ref, g_ref, b_ref):
        # LayerNorm over each sample's feature group along the lane axis.
        # Group mean/var are computed with a tiny block-averaging matmul so no
        # cross-lane reshapes are needed (kept f32 for numerics).
        mu = jnp.dot(u, gm_ref[...], preferred_element_type=jnp.float32)
        c = u - mu
        v = jnp.dot(c * c, gm_ref[...], preferred_element_type=jnp.float32)
        return c * jax.lax.rsqrt(v + 1e-5) * g_ref[...] + b_ref[...]

    # ---------- time_enc MLP, samples along lanes (block-diag weights) -------
    xm = xm_ref[0].astype(cdt)                                # [L, bb*T]
    h = jnp.dot(xm, w1_ref[...], preferred_element_type=jnp.float32) + b1_ref[...]
    h = jnp.maximum(groupnorm(h, gm1_ref, g1_ref, be1_ref), 0.0)   # [L, bb*d1]
    h = jnp.dot(h.astype(cdt), w2_ref[...],
                preferred_element_type=jnp.float32) + b2_ref[...]
    h = jnp.maximum(groupnorm(h, gm2_ref, g2_ref, be2_ref), 0.0)   # [L, bb*d2]

    # ---------- Conv1d('same') fused with (1-beta)*time_proj -----------------
    # A[p, b*d2+j] = sum_k sum_m wtcw[k,p,m] * h[b, m, j + k - pad_l]
    pad_l = (ksize - 1) // 2
    mask = mask_ref[...]                                      # [K, 1, bb*d2]
    wtcw = wtcw_ref[...]                                      # [K, P, L]
    acc = None
    for k in range(ksize):                                    # K is tiny/static
        s = k - pad_l
        if s == 0:
            sh = h
        elif s > 0:
            sh = jnp.concatenate(
                [h[:, s:], jnp.zeros((L, s), h.dtype)], axis=1)
        else:
            sh = jnp.concatenate(
                [jnp.zeros((L, -s), h.dtype), h[:, :s]], axis=1)
        # NOTE: pltpu.roll(h, shift=pad_l-k, axis=1) + the same mask is the
        # XLU-slot alternative to the static lane shift above.
        slab = (sh * mask[k]).astype(cdt)                     # [L, bb*d2]
        term = jnp.dot(wtcw[k].astype(cdt), slab,
                       preferred_element_type=jnp.float32)    # [P, bb*d2]
        acc = term if acc is None else acc + term

    # d2 -> C contraction with a block-diagonal w3 (one matmul, all samples).
    time_part = jnp.dot(acc.astype(cdt), w3_ref[...],
                        preferred_element_type=jnp.float32)   # [P, bb*C]
    # beta*history projection (beta folded into wh in the wrapper).
    hist_part = jnp.dot(wh_ref[...], xn.astype(cdt),
                        preferred_element_type=jnp.float32)   # [P, bb*C]

    pred = hist_part + time_part + bias_ref[...]              # all biases folded
    out_ref[...] = (pred * stdev + means).astype(out_ref.dtype)


def timelinear_forward(x, x_mark, params, *, beta, ksize, pred_len,
                       block_batch=None, use_bf16=False, lane_target=512,
                       lane_layout_out=False):
    B, L, C = x.shape
    T = x_mark.shape[-1]
    P = int(pred_len)
    d1 = params["w1"].shape[1]
    d2 = params["w2"].shape[1]
    f32 = jnp.float32
    wdt = jnp.bfloat16 if use_bf16 else f32

    # ---- per-step batch bb: lane-dense (bb*C % 128 == 0), grown toward the
    # lane target while keeping >= 2 grid steps (v7x dual-TC sharding). -------
    if block_batch is not None:
        bb = max(1, int(block_batch))
    else:
        bb = max(1, 128 // math.gcd(128, C))
        while (bb * 2 * C <= lane_target and bb * 2 <= max(B, 1)
               and pl.cdiv(B, bb * 2) >= 2):
            bb *= 2

    B_pad = pl.cdiv(B, bb) * bb
    if B_pad != B:
        x = jnp.concatenate([x, jnp.zeros((B_pad - B, L, C), x.dtype)], axis=0)
        x_mark = jnp.concatenate(
            [x_mark, jnp.zeros((B_pad - B, L, T), x_mark.dtype)], axis=0)
    G = B_pad // bb

    # ---- wrapper-side layout plumbing (kernel only sees lane-dense slabs) ---
    x_t = jnp.transpose(x, (1, 0, 2)).reshape(L, B_pad * C).astype(f32)
    xm3 = (x_mark.reshape(G, bb, L, T).transpose(0, 2, 1, 3)
           .reshape(G, L, bb * T)).astype(wdt)

    # ---- wrapper-side weight folding ----------------------------------------
    eye = jnp.eye(bb, dtype=f32)

    def bd(w):                               # block-diagonal repeat of a [a,b]
        return jnp.kron(eye, w.astype(f32))

    def lane_tile(v):                        # [1, d] -> [1, bb*d]
        return jnp.tile(v.astype(f32).reshape(1, -1), (1, bb))

    w1bd = bd(params["w1"]).astype(wdt)                       # [bb*T,  bb*d1]
    w2bd = bd(params["w2"]).astype(wdt)                       # [bb*d1, bb*d2]
    w3bd = bd(params["w3"]).astype(wdt)                       # [bb*d2, bb*C]
    gm1 = jnp.kron(eye, jnp.full((d1, d1), 1.0 / d1, f32))    # LN group-mean
    gm2 = jnp.kron(eye, jnp.full((d2, d2), 1.0 / d2, f32))
    b1l, g1l, be1l = map(lane_tile, (params["b1"], params["g1"], params["bb1"]))
    b2l, g2l, be2l = map(lane_tile, (params["b2"], params["g2"], params["bb2"]))

    # Fold (1-beta)*time_proj into the conv weights, beta into histroy_proj,
    # and every bias into one [P, bb*C] slab.
    wt1 = (1.0 - float(beta)) * params["wt"].astype(f32)               # [P, L]
    wtcw = jnp.einsum("pl,klm->kpm", wt1,
                      params["conv_w"].astype(f32)).astype(wdt)        # [K,P,L]
    whb = (float(beta) * params["wh"].astype(f32)).astype(wdt)         # [P, L]

    cb1 = wt1 @ params["conv_b"].astype(f32)                           # [P, 1]
    w3_colsum = jnp.sum(params["w3"].astype(f32), axis=0)              # [C]
    wt1_rowsum = jnp.sum(wt1, axis=1, keepdims=True)                   # [P, 1]
    bias_total = (float(beta) * params["bh"].astype(f32)
                  + (1.0 - float(beta)) * params["bt"].astype(f32)
                  + cb1 * w3_colsum[None, :]
                  + wt1_rowsum * params["b3"].astype(f32))             # [P, C]
    bias_lane = jnp.tile(bias_total, (1, bb))                          # [P,bb*C]

    # Lane mask per conv tap: zero contributions that would cross a sample's
    # d2-feature group when the whole [L, bb*d2] slab is shifted by k-pad_l.
    pad_l = (ksize - 1) // 2
    j = jnp.arange(d2)
    mask = jnp.stack([((j + (k - pad_l) >= 0) & (j + (k - pad_l) < d2))
                      for k in range(ksize)]).astype(f32)              # [K, d2]
    mask = jnp.tile(mask, (1, bb)).reshape(ksize, 1, bb * d2)

    weights = [w1bd, b1l, g1l, be1l, gm1,
               w2bd, b2l, g2l, be2l, gm2,
               wtcw, mask, w3bd, whb, bias_lane]

    def full_spec(a):
        nd = a.ndim
        return pl.BlockSpec(a.shape, lambda g, _n=nd: (0,) * _n)

    in_specs = ([pl.BlockSpec((L, bb * C), lambda g: (0, g)),       # x slab
                 pl.BlockSpec((1, L, bb * T), lambda g: (g, 0, 0))]  # marks
                + [full_spec(w) for w in weights])
    out_spec = pl.BlockSpec((P, bb * C), lambda g: (0, g))           # lane-dense

    # Advisory cost + explicit VMEM budget (v7x scoped default is small).
    flops_blk = 2 * (L * (bb * T) * (bb * d1) + L * (bb * d1) * (bb * d2)
                     + 2 * L * (bb * d1) ** 2 + 2 * L * (bb * d2) ** 2
                     + ksize * P * L * (bb * d2)
                     + P * (bb * d2) * (bb * C) + P * L * (bb * C))
    cost = pl.CostEstimate(
        flops=int(G * flops_blk),
        transcendentals=int(G * (bb * C + 2 * L * bb)),
        bytes_accessed=int(4 * (x_t.size + P * B_pad * C) + 2 * xm3.size
                           + G * sum(int(w.size) * w.dtype.itemsize
                                     for w in weights)),
    )
    slab_bytes = 4 * (L * bb * C + L * bb * T + P * bb * C)
    weight_bytes = sum(int(w.size) * w.dtype.itemsize for w in weights)
    vmem_limit = int(min(4 * slab_bytes + 2 * weight_bytes + (16 << 20),
                         64 << 20))

    out2d = pl.pallas_call(
        partial(timelinear_kernel, int(ksize)),
        out_shape=jax.ShapeDtypeStruct((P, B_pad * C), jnp.float32),
        grid_spec=pltpu.PrefetchScalarGridSpec(
            num_scalar_prefetch=0,
            grid=(G,),
            in_specs=in_specs,
            out_specs=out_spec,
        ),
        compiler_params=pltpu.CompilerParams(
            dimension_semantics=("parallel",),   # batch blocks independent
            vmem_limit_bytes=vmem_limit),
        cost_estimate=cost,
    )(x_t, xm3, *weights)

    if lane_layout_out:
        # v5e-friendly: hand the lane-dense [P, B*C] slab straight to the
        # consumer, skipping an extra HBM pass for the re-transpose.
        return out2d
    out = jnp.transpose(out2d.reshape(P, B_pad, C), (1, 0, 2))
    return out[:B]


def reference_forward(x, x_mark, params, *, beta, ksize, pred_len):
    """Pure-JAX mirror of the PyTorch module, for verification."""
    L = x.shape[1]
    means = jnp.mean(x, axis=1, keepdims=True)
    var = jnp.sum((x - means) ** 2, axis=1, keepdims=True) / (L - 1)
    stdev = jnp.sqrt(var + 1e-5)
    xn = (x - means) / stdev

    def ln(h, g, b):
        mu = jnp.mean(h, axis=-1, keepdims=True)
        v = jnp.mean((h - mu) ** 2, axis=-1, keepdims=True)
        return (h - mu) / jnp.sqrt(v + 1e-5) * g + b

    h = x_mark @ params["w1"] + params["b1"]
    h = jax.nn.relu(ln(h, params["g1"], params["bb1"]))
    h = h @ params["w2"] + params["b2"]
    h = jax.nn.relu(ln(h, params["g2"], params["bb2"]))               # [B, L, d2]

    d2 = h.shape[-1]
    pad_l = (ksize - 1) // 2
    pad_r = ksize - 1 - pad_l
    hp = jnp.pad(h, ((0, 0), (0, 0), (pad_l, pad_r)))
    hc = jnp.zeros_like(h) + params["conv_b"][None, :, :]
    for k in range(ksize):
        hc = hc + jnp.einsum("oi,bij->boj", params["conv_w"][k],
                             hp[:, :, k:k + d2])
    time_embed = hc @ params["w3"] + params["b3"]                     # [B, L, C]

    time_out = jnp.einsum("pl,blc->bpc", params["wt"], time_embed) + params["bt"][None]
    pred = jnp.einsum("pl,blc->bpc", params["wh"], xn) + params["bh"][None]
    pred = beta * pred + (1 - beta) * time_out
    pred = pred * stdev + means
    return pred[:, -pred_len:, :]


def init_params(key, *, seq_len, pred_len, c_out, time_dim, rda, rdb, ksize):
    d1 = c_out // rda
    d2 = c_out // rdb
    ks = jax.random.split(key, 12)

    def rn(k, shape, scale=0.1):
        return (scale * jax.random.normal(k, shape)).astype(jnp.float32)

    return {
        # time_enc linear 1 (stored transposed: [in, out]); bias as [1, out]
        "w1": rn(ks[0], (time_dim, d1)),
        "b1": rn(ks[1], (1, d1)),
        "g1": jnp.ones((1, d1), jnp.float32),
        "bb1": jnp.zeros((1, d1), jnp.float32),
        # time_enc linear 2
        "w2": rn(ks[2], (d1, d2)),
        "b2": rn(ks[3], (1, d2)),
        "g2": jnp.ones((1, d2), jnp.float32),
        "bb2": jnp.zeros((1, d2), jnp.float32),
        # Conv1d(seq_len -> seq_len, ksize): weight [K, L_out, L_in], bias [L, 1]
        "conv_w": rn(ks[4], (ksize, seq_len, seq_len)),
        "conv_b": rn(ks[5], (seq_len, 1)),
        # time_enc final linear [in, out]
        "w3": rn(ks[6], (d2, c_out)),
        "b3": rn(ks[7], (1, c_out)),
        # time_proj / histroy_proj in PyTorch layout [out, in] = [P, L]; bias [P, 1]
        "wt": rn(ks[8], (pred_len, seq_len)),
        "bt": rn(ks[9], (pred_len, 1)),
        "wh": rn(ks[10], (pred_len, seq_len)),
        "bh": rn(ks[11], (pred_len, 1)),
    }


if __name__ == "__main__":
    # Small config consistent with the module's __init__: B=8 gives a 2-step
    # grid with 4 samples per block -> 128-lane slabs.
    B, seq_len, pred_len = 8, 8, 8
    c_out, time_dim = 32, 4
    rda, rdb, ksize, beta = 4, 2, 3, 0.3

    key = jax.random.PRNGKey(0)
    kx, km, kp = jax.random.split(key, 3)
    x = jax.random.normal(kx, (B, seq_len, c_out), dtype=jnp.float32)
    x_mark = jax.random.normal(km, (B, seq_len, time_dim), dtype=jnp.float32)
    params = init_params(kp, seq_len=seq_len, pred_len=pred_len, c_out=c_out,
                         time_dim=time_dim, rda=rda, rdb=rdb, ksize=ksize)

    ref = reference_forward(x, x_mark, params, beta=beta, ksize=ksize,
                            pred_len=pred_len)

    # f32 MXU operands: bit-accuracy check.
    out = timelinear_forward(x, x_mark, params, beta=beta, ksize=ksize,
                             pred_len=pred_len)
    out = jax.block_until_ready(out)
    assert out.shape == (B, pred_len, c_out)
    assert jnp.allclose(out, ref, atol=1e-3, rtol=1e-3), "f32 kernel mismatch"

    # bf16 MXU operands with f32 accumulation (looser tolerance).
    out_bf16 = timelinear_forward(x, x_mark, params, beta=beta, ksize=ksize,
                                  pred_len=pred_len, use_bf16=True)
    out_bf16 = jax.block_until_ready(out_bf16)
    assert jnp.allclose(out_bf16, ref, atol=3e-2, rtol=3e-2), "bf16 kernel mismatch"

    print("KERNEL_OK")
</pallas_src>

<mosaic_0001>
module attributes {stable_mosaic.version = 11 : i64} {
  func.func @timelinear_kernel(%arg0: i32, %arg1: memref<8x128xf32, #tpu.memory_space<vmem>>, %arg2: memref<1x8x16xf32, #tpu.memory_space<vmem>>, %arg3: memref<16x32xf32, #tpu.memory_space<vmem>>, %arg4: memref<1x32xf32, #tpu.memory_space<vmem>>, %arg5: memref<1x32xf32, #tpu.memory_space<vmem>>, %arg6: memref<1x32xf32, #tpu.memory_space<vmem>>, %arg7: memref<32x32xf32, #tpu.memory_space<vmem>>, %arg8: memref<32x64xf32, #tpu.memory_space<vmem>>, %arg9: memref<1x64xf32, #tpu.memory_space<vmem>>, %arg10: memref<1x64xf32, #tpu.memory_space<vmem>>, %arg11: memref<1x64xf32, #tpu.memory_space<vmem>>, %arg12: memref<64x64xf32, #tpu.memory_space<vmem>>, %arg13: memref<3x8x8xf32, #tpu.memory_space<vmem>>, %arg14: memref<3x1x64xf32, #tpu.memory_space<vmem>>, %arg15: memref<64x128xf32, #tpu.memory_space<vmem>>, %arg16: memref<8x8xf32, #tpu.memory_space<vmem>>, %arg17: memref<8x128xf32, #tpu.memory_space<vmem>>, %arg18: memref<8x128xf32, #tpu.memory_space<vmem>>) attributes {dimension_semantics = [#tpu.dimension_semantics<parallel>], iteration_bounds = array<i64: 2>, scalar_prefetch = 0 : i64, scratch_operands = 0 : i64, tpu.core_type = #tpu.core_type<tc>, window_params = [{transform_indices = @transform_0, window_bounds = array<i64: 8, 128>}, {transform_indices = @transform_1, window_bounds = array<i64: 1, 8, 16>}, {pipeline_mode = #tpu.pipeline_mode<synchronous>, transform_indices = @transform_2, window_bounds = array<i64: 16, 32>}, {pipeline_mode = #tpu.pipeline_mode<synchronous>, transform_indices = @transform_3, window_bounds = array<i64: 1, 32>}, {pipeline_mode = #tpu.pipeline_mode<synchronous>, transform_indices = @transform_4, window_bounds = array<i64: 1, 32>}, {pipeline_mode = #tpu.pipeline_mode<synchronous>, transform_indices = @transform_5, window_bounds = array<i64: 1, 32>}, {pipeline_mode = #tpu.pipeline_mode<synchronous>, transform_indices = @transform_6, window_bounds = array<i64: 32, 32>}, {pipeline_mode = #tpu.pipeline_mode<synchronous>, transform_indices = @transform_7, window_bounds = array<i64: 32, 64>}, {pipeline_mode = #tpu.pipeline_mode<synchronous>, transform_indices = @transform_8, window_bounds = array<i64: 1, 64>}, {pipeline_mode = #tpu.pipeline_mode<synchronous>, transform_indices = @transform_9, window_bounds = array<i64: 1, 64>}, {pipeline_mode = #tpu.pipeline_mode<synchronous>, transform_indices = @transform_10, window_bounds = array<i64: 1, 64>}, {pipeline_mode = #tpu.pipeline_mode<synchronous>, transform_indices = @transform_11, window_bounds = array<i64: 64, 64>}, {pipeline_mode = #tpu.pipeline_mode<synchronous>, transform_indices = @transform_12, window_bounds = array<i64: 3, 8, 8>}, {pipeline_mode = #tpu.pipeline_mode<synchronous>, transform_indices = @transform_13, window_bounds = array<i64: 3, 1, 64>}, {pipeline_mode = #tpu.pipeline_mode<synchronous>, transform_indices = @transform_14, window_bounds = array<i64: 64, 128>}, {pipeline_mode = #tpu.pipeline_mode<synchronous>, transform_indices = @transform_15, window_bounds = array<i64: 8, 8>}, {pipeline_mode = #tpu.pipeline_mode<synchronous>, transform_indices = @transform_16, window_bounds = array<i64: 8, 128>}, {transform_indices = @transform_17, window_bounds = array<i64: 8, 128>}]} {
    %c0 = arith.constant 0 : index
    %c0_0 = arith.constant 0 : index
    %0 = vector.load %arg1[%c0, %c0_0] : memref<8x128xf32, #tpu.memory_space<vmem>>, vector<8x128xf32>
    %cst = arith.constant dense<0.000000e+00> : vector<128xf32>
    %1 = vector.multi_reduction <add>, %0, %cst [0] : vector<8x128xf32> to vector<128xf32>
    %2 = vector.shape_cast %1 : vector<128xf32> to vector<1x128xf32>
    %cst_1 = arith.constant 8.000000e+00 : f32
    %3 = vector.broadcast %cst_1 : f32 to vector<1x128xf32>
    %4 = arith.divf %2, %3 : vector<1x128xf32>
    %5 = vector.broadcast %4 : vector<1x128xf32> to vector<8x128xf32>
    %6 = arith.subf %0, %5 : vector<8x128xf32>
    %7 = arith.mulf %6, %6 : vector<8x128xf32>
    %cst_2 = arith.constant dense<0.000000e+00> : vector<128xf32>
    %8 = vector.multi_reduction <add>, %7, %cst_2 [0] : vector<8x128xf32> to vector<128xf32>
    %9 = vector.shape_cast %8 : vector<128xf32> to vector<1x128xf32>
    %cst_3 = arith.constant 0.142857149 : f32
    %10 = vector.broadcast %cst_3 : f32 to vector<1x128xf32>
    %11 = arith.mulf %9, %10 : vector<1x128xf32>
    %cst_4 = arith.constant 9.99999974E-6 : f32
    %12 = vector.broadcast %cst_4 : f32 to vector<1x128xf32>
    %13 = arith.addf %11, %12 : vector<1x128xf32>
    %14 = math.rsqrt %13 : vector<1x128xf32>
    %15 = arith.mulf %13, %14 : vector<1x128xf32>
    %16 = vector.broadcast %4 : vector<1x128xf32> to vector<8x128xf32>
    %17 = arith.subf %0, %16 : vector<8x128xf32>
    %18 = vector.broadcast %14 : vector<1x128xf32> to vector<8x128xf32>
    %19 = arith.mulf %17, %18 : vector<8x128xf32>
    %c0_5 = arith.constant 0 : index
    %c0_6 = arith.constant 0 : index
    %c0_7 = arith.constant 0 : index
    %20 = vector.load %arg2[%c0_5, %c0_6, %c0_7] : memref<1x8x16xf32, #tpu.memory_space<vmem>>, vector<1x8x16xf32>
    %21 = vector.shape_cast %20 : vector<1x8x16xf32> to vector<8x16xf32>
    %c0_8 = arith.constant 0 : index
    %c0_9 = arith.constant 0 : index
    %22 = vector.load %arg3[%c0_8, %c0_9] : memref<16x32xf32, #tpu.memory_space<vmem>>, vector<16x32xf32>
    %cst_10 = arith.constant dense<0.000000e+00> : vector<8x32xf32>
    %23 = tpu.matmul %21, %22, %cst_10 {dimension_numbers = #tpu.dot_dimension_numbers<[1], [0], [0], [1], [0, 0, 1, 1], [], []>} : vector<8x16xf32>, vector<16x32xf32>, vector<8x32xf32> -> vector<8x32xf32>
    %c0_11 = arith.constant 0 : index
    %c0_12 = arith.constant 0 : index
    %24 = vector.load %arg4[%c0_11, %c0_12] : memref<1x32xf32, #tpu.memory_space<vmem>>, vector<1x32xf32>
    %25 = vector.broadcast %24 : vector<1x32xf32> to vector<8x32xf32>
    %26 = arith.addf %23, %25 : vector<8x32xf32>
    %c0_13 = arith.constant 0 : index
    %c0_14 = arith.constant 0 : index
    %27 = vector.load %arg7[%c0_13, %c0_14] : memref<32x32xf32, #tpu.memory_space<vmem>>, vector<32x32xf32>
    %cst_15 = arith.constant dense<0.000000e+00> : vector<8x32xf32>
    %28 = tpu.matmul %26, %27, %cst_15 {dimension_numbers = #tpu.dot_dimension_numbers<[1], [0], [0], [1], [0, 0, 1, 1], [], []>} : vector<8x32xf32>, vector<32x32xf32>, vector<8x32xf32> -> vector<8x32xf32>
    %29 = arith.subf %26, %28 : vector<8x32xf32>
    %30 = arith.mulf %29, %29 : vector<8x32xf32>
    %c0_16 = arith.constant 0 : index
    %c0_17 = arith.constant 0 : index
    %31 = vector.load %arg7[%c0_16, %c0_17] : memref<32x32xf32, #tpu.memory_space<vmem>>, vector<32x32xf32>
    %cst_18 = arith.constant dense<0.000000e+00> : vector<8x32xf32>
    %32 = tpu.matmul %30, %31, %cst_18 {dimension_numbers = #tpu.dot_dimension_numbers<[1], [0], [0], [1], [0, 0, 1, 1], [], []>} : vector<8x32xf32>, vector<32x32xf32>, vector<8x32xf32> -> vector<8x32xf32>
    %cst_19 = arith.constant 9.99999974E-6 : f32
    %33 = vector.broadcast %cst_19 : f32 to vector<8x32xf32>
    %34 = arith.addf %32, %33 : vector<8x32xf32>
    %35 = math.rsqrt %34 : vector<8x32xf32>
    %36 = arith.mulf %29, %35 : vector<8x32xf32>
    %c0_20 = arith.constant 0 : index
    %c0_21 = arith.constant 0 : index
    %37 = vector.load %arg5[%c0_20, %c0_21] : memref<1x32xf32, #tpu.memory_space<vmem>>, vector<1x32xf32>
    %38 = vector.broadcast %37 : vector<1x32xf32> to vector<8x32xf32>
    %39 = arith.mulf %36, %38 : vector<8x32xf32>
    %c0_22 = arith.constant 0 : index
    %c0_23 = arith.constant 0 : index
    %40 = vector.load %arg6[%c0_22, %c0_23] : memref<1x32xf32, #tpu.memory_space<vmem>>, vector<1x32xf32>
    %41 = vector.broadcast %40 : vector<1x32xf32> to vector<8x32xf32>
    %42 = arith.addf %39, %41 : vector<8x32xf32>
    %cst_24 = arith.constant 0.000000e+00 : f32
    %43 = vector.broadcast %cst_24 : f32 to vector<8x32xf32>
    %44 = arith.maximumf %42, %43 : vector<8x32xf32>
    %c0_25 = arith.constant 0 : index
    %c0_26 = arith.constant 0 : index
    %45 = vector.load %arg8[%c0_25, %c0_26] : memref<32x64xf32, #tpu.memory_space<vmem>>, vector<32x64xf32>
    %cst_27 = arith.constant dense<0.000000e+00> : vector<8x64xf32>
    %46 = tpu.matmul %44, %45, %cst_27 {dimension_numbers = #tpu.dot_dimension_numbers<[1], [0], [0], [1], [0, 0, 1, 1], [], []>} : vector<8x32xf32>, vector<32x64xf32>, vector<8x64xf32> -> vector<8x64xf32>
    %c0_28 = arith.constant 0 : index
    %c0_29 = arith.constant 0 : index
    %47 = vector.load %arg9[%c0_28, %c0_29] : memref<1x64xf32, #tpu.memory_space<vmem>>, vector<1x64xf32>
    %48 = vector.broadcast %47 : vector<1x64xf32> to vector<8x64xf32>
    %49 = arith.addf %46, %48 : vector<8x64xf32>
    %c0_30 = arith.constant 0 : index
    %c0_31 = arith.constant 0 : index
    %50 = vector.load %arg12[%c0_30, %c0_31] : memref<64x64xf32, #tpu.memory_space<vmem>>, vector<64x64xf32>
    %cst_32 = arith.constant dense<0.000000e+00> : vector<8x64xf32>
    %51 = tpu.matmul %49, %50, %cst_32 {dimension_numbers = #tpu.dot_dimension_numbers<[1], [0], [0], [1], [0, 0, 1, 1], [], []>} : vector<8x64xf32>, vector<64x64xf32>, vector<8x64xf32> -> vector<8x64xf32>
    %52 = arith.subf %49, %51 : vector<8x64xf32>
    %53 = arith.mulf %52, %52 : vector<8x64xf32>
    %c0_33 = arith.constant 0 : index
    %c0_34 = arith.constant 0 : index
    %54 = vector.load %arg12[%c0_33, %c0_34] : memref<64x64xf32, #tpu.memory_space<vmem>>, vector<64x64xf32>
    %cst_35 = arith.constant dense<0.000000e+00> : vector<8x64xf32>
    %55 = tpu.matmul %53, %54, %cst_35 {dimension_numbers = #tpu.dot_dimension_numbers<[1], [0], [0], [1], [0, 0, 1, 1], [], []>} : vector<8x64xf32>, vector<64x64xf32>, vector<8x64xf32> -> vector<8x64xf32>
    %cst_36 = arith.constant 9.99999974E-6 : f32
    %56 = vector.broadcast %cst_36 : f32 to vector<8x64xf32>
    %57 = arith.addf %55, %56 : vector<8x64xf32>
    %58 = math.rsqrt %57 : vector<8x64xf32>
    %59 = arith.mulf %52, %58 : vector<8x64xf32>
    %c0_37 = arith.constant 0 : index
    %c0_38 = arith.constant 0 : index
    %60 = vector.load %arg10[%c0_37, %c0_38] : memref<1x64xf32, #tpu.memory_space<vmem>>, vector<1x64xf32>
    %61 = vector.broadcast %60 : vector<1x64xf32> to vector<8x64xf32>
    %62 = arith.mulf %59, %61 : vector<8x64xf32>
    %c0_39 = arith.constant 0 : index
    %c0_40 = arith.constant 0 : index
    %63 = vector.load %arg11[%c0_39, %c0_40] : memref<1x64xf32, #tpu.memory_space<vmem>>, vector<1x64xf32>
    %64 = vector.broadcast %63 : vector<1x64xf32> to vector<8x64xf32>
    %65 = arith.addf %62, %64 : vector<8x64xf32>
    %cst_41 = arith.constant 0.000000e+00 : f32
    %66 = vector.broadcast %cst_41 : f32 to vector<8x64xf32>
    %67 = arith.maximumf %65, %66 : vector<8x64xf32>
    %c0_42 = arith.constant 0 : index
    %c0_43 = arith.constant 0 : index
    %c0_44 = arith.constant 0 : index
    %68 = vector.load %arg14[%c0_42, %c0_43, %c0_44] : memref<3x1x64xf32, #tpu.memory_space<vmem>>, vector<3x1x64xf32>
    %c0_45 = arith.constant 0 : index
    %c0_46 = arith.constant 0 : index
    %c0_47 = arith.constant 0 : index
    %69 = vector.load %arg13[%c0_45, %c0_46, %c0_47] : memref<3x8x8xf32, #tpu.memory_space<vmem>>, vector<3x8x8xf32>
    %cst_48 = arith.constant 0.000000e+00 : f32
    %70 = vector.broadcast %cst_48 : f32 to vector<8x1xf32>
    %71 = vector.extract_strided_slice %67 {offsets = [0, 0], sizes = [8, 63], strides = [1, 1]} : vector<8x64xf32> to vector<8x63xf32>
    %72 = tpu.concatenate %70, %71 in 1 : vector<8x1xf32>, vector<8x63xf32> -> vector<8x64xf32>
    %73 = vector.extract_strided_slice %68 {offsets = [0, 0, 0], sizes = [1, 1, 64], strides = [1, 1, 1]} : vector<3x1x64xf32> to vector<1x1x64xf32>
    %74 = vector.shape_cast %73 : vector<1x1x64xf32> to vector<1x64xf32>
    %75 = vector.broadcast %74 : vector<1x64xf32> to vector<8x64xf32>
    %76 = arith.mulf %72, %75 : vector<8x64xf32>
    %77 = vector.extract_strided_slice %69 {offsets = [0, 0, 0], sizes = [1, 8, 8], strides = [1, 1, 1]} : vector<3x8x8xf32> to vector<1x8x8xf32>
    %78 = vector.shape_cast %77 : vector<1x8x8xf32> to vector<8x8xf32>
    %cst_49 = arith.constant dense<0.000000e+00> : vector<8x64xf32>
    %79 = tpu.matmul %78, %76, %cst_49 {dimension_numbers = #tpu.dot_dimension_numbers<[1], [0], [0], [1], [0, 0, 1, 1], [], []>} : vector<8x8xf32>, vector<8x64xf32>, vector<8x64xf32> -> vector<8x64xf32>
    %80 = vector.extract_strided_slice %68 {offsets = [1, 0, 0], sizes = [1, 1, 64], strides = [1, 1, 1]} : vector<3x1x64xf32> to vector<1x1x64xf32>
    %81 = vector.shape_cast %80 : vector<1x1x64xf32> to vector<1x64xf32>
    %82 = vector.broadcast %81 : vector<1x64xf32> to vector<8x64xf32>
    %83 = arith.mulf %67, %82 : vector<8x64xf32>
    %84 = vector.extract_strided_slice %69 {offsets = [1, 0, 0], sizes = [1, 8, 8], strides = [1, 1, 1]} : vector<3x8x8xf32> to vector<1x8x8xf32>
    %85 = vector.shape_cast %84 : vector<1x8x8xf32> to vector<8x8xf32>
    %cst_50 = arith.constant dense<0.000000e+00> : vector<8x64xf32>
    %86 = tpu.matmul %85, %83, %cst_50 {dimension_numbers = #tpu.dot_dimension_numbers<[1], [0], [0], [1], [0, 0, 1, 1], [], []>} : vector<8x8xf32>, vector<8x64xf32>, vector<8x64xf32> -> vector<8x64xf32>
    %87 = arith.addf %79, %86 : vector<8x64xf32>
    %88 = vector.extract_strided_slice %67 {offsets = [0, 1], sizes = [8, 63], strides = [1, 1]} : vector<8x64xf32> to vector<8x63xf32>
    %cst_51 = arith.constant 0.000000e+00 : f32
    %89 = vector.broadcast %cst_51 : f32 to vector<8x1xf32>
    %90 = tpu.concatenate %88, %89 in 1 : vector<8x63xf32>, vector<8x1xf32> -> vector<8x64xf32>
    %91 = vector.extract_strided_slice %68 {offsets = [2, 0, 0], sizes = [1, 1, 64], strides = [1, 1, 1]} : vector<3x1x64xf32> to vector<1x1x64xf32>
    %92 = vector.shape_cast %91 : vector<1x1x64xf32> to vector<1x64xf32>
    %93 = vector.broadcast %92 : vector<1x64xf32> to vector<8x64xf32>
    %94 = arith.mulf %90, %93 : vector<8x64xf32>
    %95 = vector.extract_strided_slice %69 {offsets = [2, 0, 0], sizes = [1, 8, 8], strides = [1, 1, 1]} : vector<3x8x8xf32> to vector<1x8x8xf32>
    %96 = vector.shape_cast %95 : vector<1x8x8xf32> to vector<8x8xf32>
    %cst_52 = arith.constant dense<0.000000e+00> : vector<8x64xf32>
    %97 = tpu.matmul %96, %94, %cst_52 {dimension_numbers = #tpu.dot_dimension_numbers<[1], [0], [0], [1], [0, 0, 1, 1], [], []>} : vector<8x8xf32>, vector<8x64xf32>, vector<8x64xf32> -> vector<8x64xf32>
    %98 = arith.addf %87, %97 : vector<8x64xf32>
    %c0_53 = arith.constant 0 : index
    %c0_54 = arith.constant 0 : index
    %99 = vector.load %arg15[%c0_53, %c0_54] : memref<64x128xf32, #tpu.memory_space<vmem>>, vector<64x128xf32>
    %cst_55 = arith.constant dense<0.000000e+00> : vector<8x128xf32>
    %100 = tpu.matmul %98, %99, %cst_55 {dimension_numbers = #tpu.dot_dimension_numbers<[1], [0], [0], [1], [0, 0, 1, 1], [], []>} : vector<8x64xf32>, vector<64x128xf32>, vector<8x128xf32> -> vector<8x128xf32>
    %c0_56 = arith.constant 0 : index
    %c0_57 = arith.constant 0 : index
    %101 = vector.load %arg16[%c0_56, %c0_57] : memref<8x8xf32, #tpu.memory_space<vmem>>, vector<8x8xf32>
    %cst_58 = arith.constant dense<0.000000e+00> : vector<8x128xf32>
    %102 = tpu.matmul %101, %19, %cst_58 {dimension_numbers = #tpu.dot_dimension_numbers<[1], [0], [0], [1], [0, 0, 1, 1], [], []>} : vector<8x8xf32>, vector<8x128xf32>, vector<8x128xf32> -> vector<8x128xf32>
    %103 = arith.addf %102, %100 : vector<8x128xf32>
    %c0_59 = arith.constant 0 : index
    %c0_60 = arith.constant 0 : index
    %104 = vector.load %arg17[%c0_59, %c0_60] : memref<8x128xf32, #tpu.memory_space<vmem>>, vector<8x128xf32>
    %105 = arith.addf %103, %104 : vector<8x128xf32>
    %106 = vector.broadcast %15 : vector<1x128xf32> to vector<8x128xf32>
    %107 = arith.mulf %105, %106 : vector<8x128xf32>
    %108 = vector.broadcast %4 : vector<1x128xf32> to vector<8x128xf32>
    %109 = arith.addf %107, %108 : vector<8x128xf32>
    %c0_61 = arith.constant 0 : index
    %c0_62 = arith.constant 0 : index
    %110 = vector.load %arg18[%c0_61, %c0_62] : memref<8x128xf32, #tpu.memory_space<vmem>>, vector<8x128xf32>
    tpu.vector_store %arg18[%c0_61, %c0_62], %109 {strides = array<i32>} : memref<8x128xf32, #tpu.memory_space<vmem>>, vector<8x128xf32>,
    return
  }
  func.func @transform_0(%arg0: i32) -> (i32, i32) {
    %c0_i32 = arith.constant 0 : i32
    %c0_i32_0 = arith.constant 0 : i32
    return %c0_i32, %arg0 : i32, i32
  }
  func.func @transform_1(%arg0: i32) -> (i32, i32, i32) {
    %c0_i32 = arith.constant 0 : i32
    %c0_i32_0 = arith.constant 0 : i32
    %c0_i32_1 = arith.constant 0 : i32
    return %arg0, %c0_i32, %c0_i32_0 : i32, i32, i32
  }
  func.func @transform_2(%arg0: i32) -> (i32, i32) {
    %c0_i32 = arith.constant 0 : i32
    %c0_i32_0 = arith.constant 0 : i32
    %c0_i32_1 = arith.constant 0 : i32
    return %c0_i32, %c0_i32_0 : i32, i32
  }
  func.func @transform_3(%arg0: i32) -> (i32, i32) {
    %c0_i32 = arith.constant 0 : i32
    %c0_i32_0 = arith.constant 0 : i32
    %c0_i32_1 = arith.constant 0 : i32
    return %c0_i32, %c0_i32_0 : i32, i32
  }
  func.func @transform_4(%arg0: i32) -> (i32, i32) {
    %c0_i32 = arith.constant 0 : i32
    %c0_i32_0 = arith.constant 0 : i32
    %c0_i32_1 = arith.constant 0 : i32
    return %c0_i32, %c0_i32_0 : i32, i32
  }
  func.func @transform_5(%arg0: i32) -> (i32, i32) {
    %c0_i32 = arith.constant 0 : i32
    %c0_i32_0 = arith.constant 0 : i32
    %c0_i32_1 = arith.constant 0 : i32
    return %c0_i32, %c0_i32_0 : i32, i32
  }
  func.func @transform_6(%arg0: i32) -> (i32, i32) {
    %c0_i32 = arith.constant 0 : i32
    %c0_i32_0 = arith.constant 0 : i32
    %c0_i32_1 = arith.constant 0 : i32
    return %c0_i32, %c0_i32_0 : i32, i32
  }
  func.func @transform_7(%arg0: i32) -> (i32, i32) {
    %c0_i32 = arith.constant 0 : i32
    %c0_i32_0 = arith.constant 0 : i32
    %c0_i32_1 = arith.constant 0 : i32
    return %c0_i32, %c0_i32_0 : i32, i32
  }
  func.func @transform_8(%arg0: i32) -> (i32, i32) {
    %c0_i32 = arith.constant 0 : i32
    %c0_i32_0 = arith.constant 0 : i32
    %c0_i32_1 = arith.constant 0 : i32
    return %c0_i32, %c0_i32_0 : i32, i32
  }
  func.func @transform_9(%arg0: i32) -> (i32, i32) {
    %c0_i32 = arith.constant 0 : i32
    %c0_i32_0 = arith.constant 0 : i32
    %c0_i32_1 = arith.constant 0 : i32
    return %c0_i32, %c0_i32_0 : i32, i32
  }
  func.func @transform_10(%arg0: i32) -> (i32, i32) {
    %c0_i32 = arith.constant 0 : i32
    %c0_i32_0 = arith.constant 0 : i32
    %c0_i32_1 = arith.constant 0 : i32
    return %c0_i32, %c0_i32_0 : i32, i32
  }
  func.func @transform_11(%arg0: i32) -> (i32, i32) {
    %c0_i32 = arith.constant 0 : i32
    %c0_i32_0 = arith.constant 0 : i32
    %c0_i32_1 = arith.constant 0 : i32
    return %c0_i32, %c0_i32_0 : i32, i32
  }
  func.func @transform_12(%arg0: i32) -> (i32, i32, i32) {
    %c0_i32 = arith.constant 0 : i32
    %c0_i32_0 = arith.constant 0 : i32
    %c0_i32_1 = arith.constant 0 : i32
    %c0_i32_2 = arith.constant 0 : i32
    return %c0_i32, %c0_i32_0, %c0_i32_1 : i32, i32, i32
  }
  func.func @transform_13(%arg0: i32) -> (i32, i32, i32) {
    %c0_i32 = arith.constant 0 : i32
    %c0_i32_0 = arith.constant 0 : i32
    %c0_i32_1 = arith.constant 0 : i32
    %c0_i32_2 = arith.constant 0 : i32
    return %c0_i32, %c0_i32_0, %c0_i32_1 : i32, i32, i32
  }
  func.func @transform_14(%arg0: i32) -> (i32, i32) {
    %c0_i32 = arith.constant 0 : i32
    %c0_i32_0 = arith.constant 0 : i32
    %c0_i32_1 = arith.constant 0 : i32
    return %c0_i32, %c0_i32_0 : i32, i32
  }
  func.func @transform_15(%arg0: i32) -> (i32, i32) {
    %c0_i32 = arith.constant 0 : i32
    %c0_i32_0 = arith.constant 0 : i32
    %c0_i32_1 = arith.constant 0 : i32
    return %c0_i32, %c0_i32_0 : i32, i32
  }
  func.func @transform_16(%arg0: i32) -> (i32, i32) {
    %c0_i32 = arith.constant 0 : i32
    %c0_i32_0 = arith.constant 0 : i32
    %c0_i32_1 = arith.constant 0 : i32
    return %c0_i32, %c0_i32_0 : i32, i32
  }
  func.func @transform_17(%arg0: i32) -> (i32, i32) {
    %c0_i32 = arith.constant 0 : i32
    %c0_i32_0 = arith.constant 0 : i32
    return %c0_i32, %arg0 : i32, i32
  }
}

</mosaic_0001>

<bundles_post_ra>
// kernel: tpu_custom_call.1
= control target key start
LH: loop header
LB: loop body
LE: loop exit
PB: predicated region body
PF: predicated region fallthrough
CT: control target
= control target key end

     0   :  { %s2456_s0 = inlined_call_operand.hbm [shape: f32[8,256], index: 0, kind: input, shape index: {}]   ;;  %s2457_s1 = inlined_call_operand.hbm [shape: f32[2,8,16], index: 1, kind: input, shape index: {}]   ;;  %s2458_s2 = inlined_call_operand.hbm [shape: f32[16,32], index: 2, kind: input, shape index: {}]   ;;  %s2459_s3 = inlined_call_operand.vmem [shape: f32[1,32], index: 3, kind: input, shape index: {}]   ;;  %s2460_s4 = inlined_call_operand.vmem [shape: f32[1,32], index: 4, kind: input, shape index: {}]   ;;  %s2461_s5 = inlined_call_operand.hbm [shape: f32[1,32], index: 5, kind: input, shape index: {}]   ;;  %s2462_s6 = inlined_call_operand.hbm [shape: f32[32,32], index: 6, kind: input, shape index: {}]   ;;  %s2463_s7 = inlined_call_operand.hbm [shape: f32[32,64], index: 7, kind: input, shape index: {}]   ;;  %s2464_s8 = inlined_call_operand.vmem [shape: f32[1,64], index: 8, kind: input, shape index: {}]   ;;  %s2465_s9 = inlined_call_operand.hbm [shape: f32[1,64], index: 9, kind: input, shape index: {}]   ;;  %s2466_s10 = inlined_call_operand.hbm [shape: f32[1,64], index: 10, kind: input, shape index: {}]   ;;  %s2467_s11 = inlined_call_operand.hbm [shape: f32[64,64], index: 11, kind: input, shape index: {}]   ;;  %s2468_s12 = inlined_call_operand.hbm [shape: f32[3,8,8], index: 12, kind: input, shape index: {}]   ;;  %s2469_s13 = inlined_call_operand.vmem [shape: f32[3,1,64], index: 13, kind: input, shape index: {}]   ;;  %s2470_s14 = inlined_call_operand.hbm [shape: f32[64,128], index: 14, kind: input, shape index: {}]   ;;  %s2471_s15 = inlined_call_operand.vmem [shape: f32[8,8], index: 15, kind: input, shape index: {}]   ;;  %s2472_s16 = inlined_call_operand.hbm [shape: f32[8,128], index: 16, kind: input, shape index: {}]   ;;  %s2473_s17 = inlined_call_operand.hbm [shape: f32[8,256], index: 17, kind: output, shape index: {}]  }
   0x1   :  { %2481 = sst [smem:[#allocation35_spill]] %s2456_s0 }
   0x2   :  { %2482 = sst [smem:[#allocation36_spill]] %s2457_s1 }
   0x3   :  { %2483 = sst [smem:[#allocation37_spill]] %s2458_s2 }
   0x4   :  { %2484 = sst [smem:[#allocation38_spill]] %s2461_s5 }
   0x5   :  { %2485 = sst [smem:[#allocation39_spill]] %s2462_s6 }
   0x6   :  { %2486 = sst [smem:[#allocation40_spill]] %s2463_s7 }
   0x7   :  { %2487 = sst [smem:[#allocation41_spill]] %s2465_s9 }
   0x8   :  { %2488 = sst [smem:[#allocation42_spill]] %s2466_s10 }
   0x9   :  { %2489 = sst [smem:[#allocation43_spill]] %s2467_s11 }
   0xa   :  { %2490 = sst [smem:[#allocation44_spill]] %s2468_s12 }
   0xb   :  { %2491 = sst [smem:[#allocation45_spill]] %s2469_s13 }
   0xc   :  { %2492 = sst [smem:[#allocation46_spill]] %s2470_s14 }
   0xd   :  { %2493 = sst [smem:[#allocation47_spill]] %s2471_s15 }
   0xe   :  { %2494 = sst [smem:[#allocation48_spill]] %s2472_s16 }
   0xf   :  { %2495 = sst [smem:[#allocation49_spill]] %s2473_s17 }
  0x10   :  { %22 = vsyncpa [#allocation3], 0 }
  0x11   :  { %24 = vsyncpa [#allocation3 + $0x1], 0 }
  0x12   :  { %25 = vsyncpa [#allocation6], 0 }
  0x13   :  { %27 = vsyncpa [#allocation6 + $0x1], 0 }
  0x14   :  { %28 = vsyncpa [#allocation9], 0 }
  0x15   :  { %29 = vsyncpa [#allocation12], 0 }
  0x16   :  { %30 = vsyncpa [#allocation15], 0 }
  0x17   :  { %31 = vsyncpa [#allocation18], 0 }
  0x18   :  { %32 = vsyncpa [#allocation21], 0 }
  0x19   :  { %33 = vsyncpa [#allocation4], 0 }
  0x1a   :  { %35 = vsyncpa [#allocation4 + $0x1], 0  ;;  %s2160_s24 = smov 0   ;;  %s2162_s25 = smov 0  }
  0x1b   :  { %s2164_s26 = smov 0   ;;  %s2166_s27 = smov 0  }
  0x1c LB: > { %2496 = sst [smem:[#allocation32_spill]] %s2049_s26  ;;  %s2184_s30 = sadd.s32 4294967295, %s2053_s27   ;;  %s2053_s27 = sphi %s2166_s27, %s2522_s27   ;;  %s2049_s26 = sphi %s2164_s26, %s2527_s26   ;;  %s2045_s25 = sphi %s2162_s25, %s2526_s25   ;;  %s2041_s24 = sphi %s2160_s24, %s2525_s24  }
  0x1d   : > { %s2497_s2 = sld [smem:[#allocation37_spill]]  ;;  %p1380_p0 = scmp.ge.s32.totalorder %s2053_s27, 1 }
  0x1e   : > { %p62_p1 = scmp.eq.s32.totalorder %s2184_s30, 0  ;;  %p439_p2 = scmp.lt.s32.totalorder %s2053_s27, 3 }
  0x1f   : > { %s2055_s19 = smov [#allocation7]   ;;  %s2499_s5 = sld [smem:[#allocation38_spill]] }
  0x20   : > { %p2189_p3 = pnand %p1380_p0, %p439_p2  ;;  %s452_s1 = sshll.u32 %s2055_s19, 4  ;;  %s453_s1 = int_to_ptr.vmem [resolvable:$true] %s452_s1 }
  0x21   : > { %s2501_s7 = sld [smem:[#allocation40_spill]]  ;;  %s2057_s15 = smov 128  }
  0x22   : > { %p1471_p4 = pneg %p2189_p3  ;;  %s2058_s13 = smov 8  }
  0x23   : > { %s450_s0 = sshll.u32 %s2497_s2, 4  ;;  %s2056_s2 = smov [#allocation8]   ;;  %s451_s0 = int_to_ptr.hbm [resolvable:$true] %s450_s0 }
  0x24   : > { %p2201_p6 = pnand %p1471_p4, %p62_p1  ;;  %s473_s17 = sshll.u32 %s2056_s2, 4  ;;  %s474_s17 = int_to_ptr.vmem [resolvable:$true] %s473_s17 }
  0x25   : > { %s471_s22 = sshll.u32 %s2499_s5, 4  ;;  %s2502_s10 = sld [smem:[#allocation42_spill]]  ;;  %s472_s22 = int_to_ptr.hbm [resolvable:$true] %s471_s22 }
  0x26   : > { %1474 = dma.hbm_to_vmem [thread:$0]  (!%p2201_p6), %s451_s0, 256, %s453_s1, [#allocation6], %s2057_s15, %s2057_s15, %s2058_s13  }
  0x27   : > { %s496_s19 = sshll.u32 %s2501_s7, 4  ;;  %s2059_s28 = smov [#allocation11]   ;;  %s497_s19 = int_to_ptr.hbm [resolvable:$true] %s496_s19 }
  0x28   : > { %1477 = dma.hbm_to_vmem [thread:$0]  (!%p2201_p6), %s472_s22, 16, %s474_s17, [#allocation9]  }
  0x29   : > { %s498_s29 = sshll.u32 %s2059_s28, 4  ;;  %s2060_s2 = smov [#allocation14]   ;;  %s499_s29 = int_to_ptr.vmem [resolvable:$true] %s498_s29 }
  0x2a   : > { %1483 = dma.hbm_to_vmem [thread:$0]  (!%p2201_p6), %s497_s19, 512, %s499_s29, [#allocation12], %s2057_s15, %s2057_s15, %s2058_s13  }
  0x2b   : > { %s526_s5 = sshll.u32 %s2502_s10, 4  ;;  %s528_s0 = sshll.u32 %s2060_s2, 4  ;;  %s527_s5 = int_to_ptr.hbm [resolvable:$true] %s526_s5  ;;  %s529_s0 = int_to_ptr.vmem [resolvable:$true] %s528_s0 }
  0x2c   : > { %s2503_s12 = sld [smem:[#allocation44_spill]]  ;;  %s2061_s28 = smov [#allocation17]  }
  0x2d   : > { %1489 = dma.hbm_to_vmem [thread:$0]  (!%p2201_p6), %s527_s5, 16, %s529_s0, [#allocation15]  }
  0x2e   : > { %s2504_s6 = sld [smem:[#allocation39_spill]]  ;;  %s553_s10 = sshll.u32 %s2061_s28, 4  ;;  %s554_s10 = int_to_ptr.vmem [resolvable:$true] %s553_s10 }
  0x2f   : > { %s2062_s7 = smov [#allocation10]   ;;  %s2505_s9 = sld [smem:[#allocation41_spill]] }
  0x30   : > { %s484_s19 = sshll.u32 %s2062_s7, 4  ;;  %s2506_s11 = sld [smem:[#allocation43_spill]]  ;;  %s485_s19 = int_to_ptr.vmem [resolvable:$true] %s484_s19 }
  0x31   : > { %s2063_s20 = smov [#allocation13]   ;;  %s2507_s14 = sld [smem:[#allocation46_spill]] }
  0x32   : > { %s551_s17 = sshll.u32 %s2503_s12, 4  ;;  %s2508_s16 = sld [smem:[#allocation48_spill]]  ;;  %s552_s17 = int_to_ptr.hbm [resolvable:$true] %s551_s17 }
  0x33   : > { %1495 = dma.hbm_to_vmem [thread:$0]  (!%p2201_p6), %s552_s17, 384, %s554_s10, [#allocation18], %s2057_s15, %s2057_s15, %s2058_s13  }
  0x34   : > { %s482_s21 = sshll.u32 %s2504_s6, 4  ;;  %s516_s10 = sshll.u32 %s2063_s20, 4  ;;  %s483_s21 = int_to_ptr.hbm [resolvable:$true] %s482_s21  ;;  %s517_s10 = int_to_ptr.vmem [resolvable:$true] %s516_s10 }
  0x35   : > { %s514_s5 = sshll.u32 %s2505_s9, 4  ;;  %s2064_s17 = smov [#allocation16]   ;;  %s515_s5 = int_to_ptr.hbm [resolvable:$true] %s514_s5 }
  0x36   : > { %1480 = dma.hbm_to_vmem [thread:$0]  (!%p2201_p6), %s483_s21, 512, %s485_s19, [#allocation9], %s2057_s15, %s2057_s15, %s2058_s13  }
  0x37   : > { %s537_s22 = sshll.u32 %s2506_s11, 4  ;;  %s539_s28 = sshll.u32 %s2064_s17, 4  ;;  %s538_s22 = int_to_ptr.hbm [resolvable:$true] %s537_s22  ;;  %s540_s28 = int_to_ptr.vmem [resolvable:$true] %s539_s28 }
  0x38   : > { %1486 = dma.hbm_to_vmem [thread:$0]  (!%p2201_p6), %s515_s5, 16, %s517_s10, [#allocation12]  }
  0x39   : > { %s568_s21 = sshll.u32 %s2507_s14, 4  ;;  %s586_s5 = sshll.u32 %s2508_s16, 4  ;;  %s569_s21 = int_to_ptr.hbm [resolvable:$true] %s568_s21  ;;  %s587_s5 = int_to_ptr.hbm [resolvable:$true] %s586_s5 }
  0x3a   : > { %1492 = dma.hbm_to_vmem [thread:$0]  (!%p2201_p6), %s538_s22, 1024, %s540_s28, [#allocation15], %s2057_s15, %s2057_s15, %s2058_s13  }
  0x3b   : > { %s2065_s0 = smov [#allocation19]   ;;  %s2066_s22 = smov [#allocation20]  }
  0x3c   : > { %s570_s1 = sshll.u32 %s2065_s0, 4  ;;  %s588_s20 = sshll.u32 %s2066_s22, 4  ;;  %s571_s1 = int_to_ptr.vmem [resolvable:$true] %s570_s1  ;;  %s589_s20 = int_to_ptr.vmem [resolvable:$true] %s588_s20 }
  0x3d   : > { %1498 = dma.hbm_to_vmem [thread:$0]  (!%p2201_p6), %s569_s21, 1024, %s571_s1, [#allocation18], %s2057_s15, %s2057_s15, %s2058_s13  }
  0x3e   : > { %1501 = dma.hbm_to_vmem [thread:$0]  (!%p2201_p6), %s587_s5, 128, %s589_s20, [#allocation21]  }
  0x3f   : > { %s1379_s10 = sadd.s32 4294967294, %s2053_s27   ;;  %s2269_s17 = sadd.s32 1, %s2053_s27  }
  0x40   : > { %2509 = sst [smem:[#allocation33_spill]] %s2269_s17  ;;  %s45_s28 = ssub.s32 %s2053_s27, %s2269_s17 }
  0x41   : > { %s48_s7 = sadd.s32 1, %s2049_s26  ;;  %p46_p7 = scmp.eq.s32.totalorder %s45_s28, 0 }
  0x42   : > { %p55_p8 = scmp.ne.s32.totalorder %s2049_s26, %s2045_s25  ;;  %p56_p9 = scmp.eq.s32.totalorder %s2053_s27, 0 }
  0x43   : > { %p61_p10 = scmp.ne.s32.totalorder %s2045_s25, %s2041_s24  ;;  %p426_p13 = scmp.eq.s32.totalorder %s2184_s30, 1 }
  0x44   : > { %s2280_s13 = scalar_select %p46_p7, %s2049_s26, %s48_s7  }
  0x45   : > { %p2282_p11 = por %p56_p9, %p55_p8  ;;  %p2288_p12 = por %p62_p1, %p61_p10 }
  0x46   : > { %2510 = sst [smem:[#allocation34_spill]] %s2280_s13  ;;  %p432_p0 = scmp.eq.s32.totalorder %s1379_s10, 1 }
  0x47   : > { %p1523_p2 = scmp.lt.s32.totalorder %s2053_s27, 2  ;;  %s599_s29 = sand.u32 1, %s2049_s26  }
  0x48   : > { %p2295_p4 = por %p426_p13, %p55_p8  ;;  %p2299_p6 = por %p432_p0, %p61_p10 }
  0x49   : > { %s2303_s2 = sshll.u32 %s599_s29, 3  ;;  %s1393_s5 = sshll.u32 %s2053_s27, 3 }
  0x4a   : > { %s2515_s22 = sld [smem:[#allocation35_spill]]  ;;  %s603_s28 = scalar_lea.vmem [#allocation2], %s2303_s2 }
  0x4b   : > { %s611_s10 = sshll.u32 %s603_s28, 4  ;;  %p2312_p7 = pnand %p1523_p2, %p2282_p11  ;;  %s612_s10 = int_to_ptr.vmem [resolvable:$true] %s611_s10 }
  0x4c   : > { %s2517_s12 = sld [smem:[#allocation36_spill]]  ;;  %s618_s16 = sand.u32 1, %s2053_s27  }
  0x4d   : > { %s600_s13 = scalar_lea.sflag [#allocation3], %s599_s29  ;;  %p1903_p9 = pneg %p2312_p7 }
  0x50   : > { %s607_s20 = scalar_lea.hbm %s2515_s22, %s1393_s5  ;;  %s1906_s28 = scalar_lea.hbm %s2515_s22, 16 }
  0x51   : > { %s609_s7 = sshll.u32 %s607_s20, 4  ;;  %s610_s7 = int_to_ptr.hbm [resolvable:$true] %s609_s7 }
  0x52   : > { %s626_s14 = scalar_lea.hbm %s2517_s12, %s1393_s5  ;;  %s1899_s0 = sshra.s32 %s610_s7, 4  ;;  %s1900_s0 = int_to_ptr.hbm [resolvable:$true] %s1899_s0 }
  0x53   : > { %s1901_s1 = scalar_lea.hbm %s1900_s0, 8  ;;  %p1907_p13 = scmp.lt.s32.totalorder %s1900_s0, %s2515_s22 }
  0x54   : > { %p1902_p8 = scmp.ne.s32.totalorder %s1900_s0, %s1901_s1  ;;  %p1908_p0 = scmp.lt.s32.totalorder %s1906_s28, %s1901_s1 }
  0x56   : > { %p1904_p10 = pnand %p1903_p9, %p1902_p8  ;;  %p1909_p2 = por %p1908_p0, %p1907_p13 }
  0x58   : > { %p1905_p11 = pneg %p1904_p10 }
  0x5a   : > { %p1910_p5 = pnand %p1909_p2, %p1905_p11 }
  0x5c   : > { %1913 = shalt.err (!%p1910_p5)
}
  0x5d   : > { %1505 = dma.hbm_to_vmem [thread:$0]  (!%p2312_p7), %s610_s7, 128, %s612_s10, %s600_s13  }
  0x5e   : > { %s628_s29 = sshll.u32 %s626_s14, 4  ;;  %s622_s5 = scalar_lea.vmem [#allocation5], %s2303_s2  ;;  %s629_s29 = int_to_ptr.hbm [resolvable:$true] %s628_s29 }
  0x5f   : > { %s630_s26 = sshll.u32 %s622_s5, 4  ;;  %s619_s15 = scalar_lea.sflag [#allocation6], %s618_s16  ;;  %s631_s26 = int_to_ptr.vmem [resolvable:$true] %s630_s26 }
  0x60   : > { %s1929_s20 = sshra.s32 %s629_s29, 4  ;;  %s1936_s28 = scalar_lea.hbm %s2517_s12, 16  ;;  %s1930_s20 = int_to_ptr.hbm [resolvable:$true] %s1929_s20 }
  0x61   : > { %s1931_s17 = scalar_lea.hbm %s1930_s20, 8  ;;  %p1937_p5 = scmp.lt.s32.totalorder %s1930_s20, %s2517_s12 }
  0x62   : > { %p1932_p8 = scmp.ne.s32.totalorder %s1930_s20, %s1931_s17  ;;  %p1938_p13 = scmp.lt.s32.totalorder %s1936_s28, %s1931_s17 }
  0x64   : > { %p1934_p10 = pnand %p1932_p8, %p1903_p9  ;;  %p1939_p0 = por %p1938_p13, %p1937_p5 }
  0x66   : > { %p1935_p11 = pneg %p1934_p10 }
  0x68   : > { %p1940_p2 = pnand %p1939_p0, %p1935_p11 }
  0x6a   : > { %1943 = shalt.err (!%p1940_p2)
}
  0x6b   : > { %1508 = dma.hbm_to_vmem [thread:$0]  (!%p2312_p7), %s629_s29, 128, %s631_s26, %s619_s15  }
  0x6c   : > { %639 = sbr.rel (%p2189_p3) target bundleno = 1374 (0x55e), region = 88  ;;  %s2348_s14 = sand.u32 (!%p2189_p3), 1, %s2045_s25  }
  0x6d   : > { %s2351_s16 = sshll.u32 (!%p2189_p3), %s2348_s14, 3  ;;  %s642_s2 = scalar_lea.sflag (!%p2189_p3), [#allocation3], %s2348_s14 }
  0x6e   : > { %s645_s17 = scalar_lea.vmem (!%p2189_p3), [#allocation2], %s2351_s16 }
  0x71   : > { %2004 = dma.done.wait (%p2288_p12), %s642_s2, 128  }
  0x72   : > { %2006 = vsyncadd (%p2288_p12), %s642_s2, 4294967168  ;;  %s651_s6 = sand.u32 1, %s2184_s30   ;;  %s655_s18 = scalar_lea.vmem [#allocation5], %s2351_s16 }
  0x73   : > { %s652_s26 = scalar_lea.sflag [#allocation6], %s651_s6 }
  0x74   : > { %2008 = dma.done.wait (%p2288_p12), %s652_s26, 128  }
  0x75   : > { %2010 = vsyncadd (%p2288_p12), %s652_s26, 4294967168 }
  0x76   : > { %2012 = dma.done.wait (%p62_p1), [#allocation6], 256  }
  0x77   : > { %2014 = vsyncadd (%p62_p1), [#allocation6], 4294967040 }
  0x78   : > { %2016 = dma.done.wait (%p62_p1), [#allocation9], 528  }
  0x79   : > { %2018 = vsyncadd (%p62_p1), [#allocation9], 4294966768 }
  0x7a   : > { %2020 = dma.done.wait (%p62_p1), [#allocation12], 528  }
  0x7b   : > { %2022 = vsyncadd (%p62_p1), [#allocation12], 4294966768 }
  0x7c   : > { %2024 = dma.done.wait (%p62_p1), [#allocation15], 1040  }
  0x7d   : > { %2026 = vsyncadd (%p62_p1), [#allocation15], 4294966256 }
  0x7e   : > { %2028 = dma.done.wait (%p62_p1), [#allocation18], 1408  }
  0x7f   : > { %2030 = vsyncadd (%p62_p1), [#allocation18], 4294965888 }
  0x80   : > { %2032 = dma.done.wait (%p62_p1), [#allocation21], 128  }
  0x81   : > { %2034 = vsyncadd (%p62_p1), [#allocation21], 4294967168  ;;  %v801_v0 = vld [vmem:[#allocation7 + $0x8] sm:$0xff]  ;;  %v800_v1 = vld [vmem:[#allocation7] sm:$0xff]  ;;  %vm806_vm0 = vcmask 130048   ;;  %vm834_vm1 = vcmask 261120  }
  0x82   : > { %v799_v2 = vld [vmem:[%s655_s18] sm:$0xff]  ;;  %824 = vmatpush.msra.mxu0 %v801_v0  ;;  %v832_v4 = vld [vmem:[#allocation10 + $0x10] sm:$0xff]  ;;  %v1582_v7 = vld [vmem:[%s2459_s3] ss:$0 sm:$0xff]  ;;  %vm944_vm5 = vcmask 523264   ;;  %s2518_s0 = sld [smem:[#allocation45_spill]] }
  0x83   : > { %v833_v3 = vld [vmem:[#allocation10 + $0x18] sm:$0xff]  ;;  %v831_v5 = vld [vmem:[#allocation10 + $0x8] sm:$0xff]  ;;  %v830_v6 = vld [vmem:[#allocation10] sm:$0xff]  ;;  %s2067_s1 = smov 1   ;;  %s2068_s28 = smov 127   ;;  %vm1035_vm9 = vcmask 64512  }
  0x84   : > { %850 = vmatpush.msra.mxu1 %v833_v3  ;;  %875 = vmatpush.msra.mxu2 %v833_v3  ;;  %v908_v13 = vld [vmem:[#allocation11 + $0x18] sm:$0xff]  ;;  %v907_v14 = vld [vmem:[#allocation11 + $0x10] sm:$0xff]  ;;  %v906_v15 = vld [vmem:[#allocation11 + $0x8] sm:$0xff]  ;;  %vm1025_vm10 = vcmask 7168   ;;  %vm1085_vm11 = vcmask 515072   ;;  %s2519_s18 = sld [smem:[#allocation47_spill]] }
  0x85   : > { %825 = vmatpush.msra.mxu0 %v800_v1  ;;  %928 = vmatpush.msra.mxu3 %v908_v13  ;;  %v905_v16 = vld [vmem:[#allocation11] sm:$0xff]  ;;  %v942_v18 = vld [vmem:[#allocation16 + $0x30] sm:$0xff]  ;;  %v941_v19 = vld [vmem:[#allocation16 + $0x28] sm:$0xff]  ;;  %s1422_s23 = sshll.u32 %s2184_s30, 3  ;;  %s2520_s11 = sld [smem:[#allocation49_spill]] }
  0x86   : > { %1410 = vmatmul.msk.f32.vlgmr.msra.gmra.mxu0 %vm806_vm0, %v799_v2  ;;  %851 = vmatpush.msra.mxu1 %v832_v4  ;;  %v943_v17 = vld [vmem:[#allocation16 + $0x38] sm:$0xff]  ;;  %v940_v22 = vld [vmem:[#allocation16 + $0x20] sm:$0xff]  ;;  %v938_v24 = vld [vmem:[#allocation16 + $0x10] sm:$0xff]  ;;  %s761_s5 = scalar_lea.vmem [#allocation22], %s2351_s16 }
  0x87   : > { %876 = vmatpush.msra.mxu2 %v832_v4  ;;  %929 = vmatpush.msra.mxu3 %v907_v14  ;;  %v939_v23 = vld [vmem:[#allocation16 + $0x18] sm:$0xff]  ;;  %v1583_v31 = vld [vmem:[%s2460_s4] ss:$0 sm:$0xff]  ;;  %v936_v39 = vld [vmem:[#allocation16] sm:$0xff]  ;;  %s1188_s15 = sshll.u32 %s761_s5, 4  ;;  %s1189_s15 = int_to_ptr.vmem [resolvable:$true] %s1188_s15 }
  0x88   : > { %852 = vmatpush.msra.mxu1 %v831_v5  ;;  %956 = vmatpush.msrb.mxu0 %v943_v17  ;;  %v1584_v34 = vld [vmem:[#allocation8] ss:$0 sm:$0xff]  ;;  %v937_v38 = vld [vmem:[#allocation16 + $0x8] sm:$0xff]  ;;  %v1586_v54 = vld [vmem:[#allocation13] ss:$0 sm:$0xff] }
  0x89   : > { %877 = vmatpush.msra.mxu2 %v831_v5  ;;  %930 = vmatpush.msra.mxu3 %v906_v15  ;;  %v1585_v40 = vld [vmem:[%s2464_s8] ss:$0 sm:$0xff]  ;;  %v1587_v57 = vld [vmem:[#allocation14] ss:$0 sm:$0xff]  ;;  %v1588_v60 = vld [vmem:[%s2518_s0 + $0x1] ss:$0 sm:$0xff] }
  0x8a   : > { %853 = vmatpush.msra.mxu1 %v830_v6  ;;  %957 = vmatpush.msrb.mxu0 %v942_v18  ;;  %v1019_v63 = vld [vmem:[#allocation17 + $0x8] sm:$0xff]  ;;  %v1018_v4 = vld [vmem:[#allocation17] sm:$0xff]  ;;  %v1122_v5 = vld [vmem:[#allocation19 + $0x38] sm:$0xff] }
  0x8b   : > { %878 = vmatpush.msra.mxu2 %v830_v6  ;;  %931 = vmatpush.msra.mxu3 %v905_v16  ;;  %v1589_v0 = vld [vmem:[%s2518_s0] ss:$0 sm:$0xff]  ;;  %s1186_s29 = scalar_lea.hbm %s2520_s11, %s1422_s23  ;;  %s1979_s2 = scalar_lea.hbm %s2520_s11, 16 }
  0x8c   : > { %981 = vmatpush.msrb.mxu1 %v943_v17  ;;  %958 = vmatpush.msrb.mxu0 %v941_v19  ;;  %v1121_v6 = vld [vmem:[#allocation19 + $0x30] sm:$0xff]  ;;  %s1190_s20 = sshll.u32 %s1186_s29, 4  ;;  %s1191_s20 = int_to_ptr.hbm [resolvable:$true] %s1190_s20 }
  0x8d   : > { %v762_v13 = vld [vmem:[%s645_s17] sm:$0xff]  ;;  %s1973_s30 = sshra.s32 %s1191_s20, 4  ;;  %s1974_s30 = int_to_ptr.hbm [resolvable:$true] %s1973_s30 }
  0x8e   : > { %982 = vmatpush.msrb.mxu1 %v942_v18  ;;  %959 = vmatpush.msrb.mxu0 %v940_v22  ;;  %v763_v14 = vrot.slane %v762_v13, 4  ;;  %p1980_p7 = scmp.lt.s32.totalorder %s1974_s30, %s2520_s11 }
  0x90   : > { %983 = vmatpush.msrb.mxu1 %v941_v19  ;;  %960 = vmatpush.msrb.mxu0 %v939_v23  ;;  %v764_v16 = vadd.f32 %v763_v14, %v762_v13 }
  0x92   : > { %984 = vmatpush.msrb.mxu1 %v940_v22  ;;  %961 = vmatpush.msrb.mxu0 %v938_v24  ;;  %v765_v18 = vrot.slane %v764_v16, 2 }
  0x94   : > { %985 = vmatpush.msrb.mxu1 %v939_v23  ;;  %962 = vmatpush.msrb.mxu0 %v937_v38  ;;  %v766_v22 = vadd.f32 %v765_v18, %v764_v16 }
  0x96   : > { %986 = vmatpush.msrb.mxu1 %v938_v24  ;;  %963 = vmatpush.msrb.mxu0 %v936_v39  ;;  %v1118_v24 = vld [vmem:[#allocation19 + $0x18] sm:$0xff] }
  0x98   : > { %987 = vmatpush.msrb.mxu1 %v937_v38 }
  0x9a   : > { %988 = vmatpush.msrb.mxu1 %v936_v39 }
 0x103   : > { %v827_v8 = vpop.f32.mrf.mxu0 }
 0x104   : > { %v828_v9 = vadd.f32 %v1582_v7, %v827_v8  ;;  %v1590_v7 = vld [vmem:[%s2518_s0 + $0x2] ss:$0 sm:$0xff] }
 0x106   : > { %1411 = vmatmul.msk.f32.vlgmr.msra.gmra.mxu1 %vm834_vm1, %v828_v9 }
 0x183   : > { %v855_v10 = vpop.f32.mrf.mxu1 }
 0x184   : > { %v858_v11 = vsub.f32 %v828_v9, %v855_v10 }
 0x186   : > { %v859_v12 = vmul.f32 %v858_v11, %v858_v11 }
 0x188   : > { %1412 = vmatmul.msk.f32.vlgmr.msra.gmra.mxu2 %vm834_vm1, %v859_v12  ;;  %v2069_v12 = vmov 8.0  }
 0x20b   : > { %v880_v20 = vpop.f32.mrf.mxu2 }
 0x20c   : > { %v881_v21 = vadd.f32 1e-05, %v880_v20  ;;  %v1120_v20 = vld [vmem:[#allocation19 + $0x28] sm:$0xff] }
 0x20e   : > { %1591 = vrsqrt.f32 %v881_v21  ;;  %vm889_vm3 = vweird.f32 %v881_v21 }
 0x214   : > { %v1592_v25 = vpop.eup %1591 }
 0x215   : > { %v884_v26 = vmul.f32 %v1592_v25, %v881_v21  ;;  %vm890_vm2 = vweird.f32 %v1592_v25  ;;  %v1119_v21 = vld [vmem:[#allocation19 + $0x20] sm:$0xff] }
 0x216   : > { %vm891_vm4 = vmor %vm889_vm3, %vm890_vm2 }
 0x217   : > { %v885_v27 = vmul.f32 %v1592_v25, %v884_v26 }
 0x219   : > { %v886_v28 = vmul.f32 0.5, %v885_v27 }
 0x21b   : > { %v887_v29 = vsub.f32 1.5, %v886_v28 }
 0x21d   : > { %v888_v30 = vmul.f32 %v1592_v25, %v887_v29 }
 0x21f   : > { %v892_v32 = vsel %vm891_vm4, %v1592_v25, %v888_v30  ;;  %v767_v25 = vrot.slane %v766_v22, 1 }
 0x220   : > { %v893_v33 = vmul.f32 %v892_v32, %v858_v11  ;;  %v1020_v11 = vld [vmem:[#allocation17 + $0x10] sm:$0xff] }
 0x221   : > { %v768_v27 = vadd.f32 %v767_v25, %v766_v22 }
 0x222   : > { %v898_v35 = vmul.f32 %v1583_v31, %v893_v33 }
 0x224   : > { %v903_v36 = vadd.f32 %v1584_v34, %v898_v35 }
 0x226   : > { %v904_v37 = vmax.f32 %v903_v36, 0.0 }
 0x228   : > { %1413 = vmatmul.msk.f32.vlgmr.msra.gmra.mxu3 %vm834_vm1, %v904_v37 }
 0x2ab   : > { %v933_v41 = vpop.f32.mrf.mxu3 }
 0x2ac   : > { %v934_v42 = vadd.f32 %v1585_v40, %v933_v41  ;;  %v1117_v40 = vld [vmem:[#allocation19 + $0x10] sm:$0xff] }
 0x2ae   : > { %1414 = vmatmul.msk.f32.vlgmr.msrb.gmra.mxu0 %vm944_vm5, %v934_v42 }
 0x32b   : > { %v965_v43 = vpop.f32.mrf.mxu0 }
 0x32c   : > { %v968_v44 = vsub.f32 %v934_v42, %v965_v43 }
 0x32e   : > { %v969_v45 = vmul.f32 %v968_v44, %v968_v44 }
 0x330   : > { %1415 = vmatmul.msk.f32.vlgmr.msrb.gmra.mxu1 %vm944_vm5, %v969_v45 }
 0x3ad   : > { %v990_v46 = vpop.f32.mrf.mxu1 }
 0x3ae   : > { %v991_v47 = vadd.f32 1e-05, %v990_v46  ;;  %v1115_v46 = vld [vmem:[#allocation19] sm:$0xff] }
 0x3b0   : > { %1593 = vrsqrt.f32 %v991_v47  ;;  %vm999_vm7 = vweird.f32 %v991_v47 }
 0x3b1   : > { %1595 = vrcp.f32 %v2069_v12 }
 0x3b6   : > { %v1594_v48 = vpop.eup %1593 }
 0x3b7   : > { %v994_v49 = vmul.f32 %v1594_v48, %v991_v47  ;;  %vm1000_vm6 = vweird.f32 %v1594_v48  ;;  %v1596_v15 = vpop.eup %1595 }
 0x3b8   : > { %vm1001_vm8 = vmor %vm999_vm7, %vm1000_vm6  ;;  %v770_v17 = vmul.f32 8.0, %v1596_v15  ;;  %vm774_vm12 = vweird.f32 %v1596_v15 }
 0x3b9   : > { %v995_v50 = vmul.f32 %v1594_v48, %v994_v49 }
 0x3ba   : > { %v771_v19 = vsub.f32 1.0, %v770_v17 }
 0x3bb   : > { %v996_v51 = vmul.f32 0.5, %v995_v50 }
 0x3bc   : > { %v772_v23 = vmul.f32 %v1596_v15, %v771_v19 }
 0x3bd   : > { %v997_v52 = vsub.f32 1.5, %v996_v51  ;;  %v1146_v51 = vld [vmem:[%s2519_s18] sm:$0xff] }
 0x3be   : > { %v773_v26 = vadd.f32 %v1596_v15, %v772_v23 }
 0x3bf   : > { %v998_v53 = vmul.f32 %v1594_v48, %v997_v52 }
 0x3c0   : > { %v775_v28 = vsel %vm774_vm12, %v1596_v15, %v773_v26 }
 0x3c1   : > { %v1002_v55 = vsel %vm1001_vm8, %v1594_v48, %v998_v53  ;;  %v776_v29 = vmul.f32 %v775_v28, %v768_v27 }
 0x3c2   : > { %v1003_v56 = vmul.f32 %v1002_v55, %v968_v44  ;;  %v1116_v44 = vld [vmem:[#allocation19 + $0x8] sm:$0xff] }
 0x3c3   : > { %v777_v30 = vsub.f32 %v762_v13, %v776_v29 }
 0x3c4   : > { %v1008_v58 = vmul.f32 %v1586_v54, %v1003_v56 }
 0x3c5   : > { %v778_v31 = vmul.f32 %v777_v30, %v777_v30 }
 0x3c6   : > { %v1013_v59 = vadd.f32 %v1587_v57, %v1008_v58 }
 0x3c7   : > { %v779_v32 = vrot.slane %v778_v31, 4 }
 0x3c8   : > { %v1014_v61 = vmax.f32 %v1013_v59, 0.0  ;;  %v1170_v59 = vld [vmem:[#allocation20] sm:$0xff] }
 0x3c9   : > { %v780_v33 = vadd.f32 %v779_v32, %v778_v31 }
 0x3ca   : > { %1022 = vrot.lane.b32.xlu0 %v1014_v61, %s2067_s1  ;;  %v1034_v62 = vmul.f32 %v1588_v60, %v1014_v61  ;;  %s1176_s1 = scalar_lea.sflag [#allocation4], %s2348_s14 }
 0x3cb   : > { %v781_v34 = vrot.slane %v780_v33, 2 }
 0x3cc   : > { %1054 = vmatpush.msrb.mxu2 %v1034_v62 }
 0x3cd   : > { %1416 = vmatmul.msk.f32.vlgmr.msrb.gmra.mxu2 %vm1035_vm9, %v1019_v63  ;;  %v782_v35 = vadd.f32 %v781_v34, %v780_v33 }
 0x3cf   : > { %v783_v36 = vrot.slane %v782_v35, 1 }
 0x3d1   : > { %v784_v37 = vadd.f32 %v783_v36, %v782_v35 }
 0x3d2   : > { %1082 = vrot.lane.b32.xlu0 %v1014_v61, %s2068_s28  ;;  %s1975_s28 = scalar_lea.hbm %s1974_s30, 8 }
 0x3d3   : > { %v785_v38 = vmul.f32 0.14285715, %v784_v37  ;;  %p1976_p1 = scmp.ne.s32.totalorder %s1974_s30, %s1975_s28  ;;  %p1981_p9 = scmp.lt.s32.totalorder %s1979_s2, %s1975_s28 }
 0x3d5   : > { %v786_v39 = vadd.f32 1e-05, %v785_v38  ;;  %p1977_p3 = pnand %p1976_p1, %p2295_p4  ;;  %p1982_p8 = por %p1981_p9, %p1980_p7 }
 0x3d7   : > { %1597 = vrsqrt.f32 %v786_v39  ;;  %vm793_vm13 = vweird.f32 %v786_v39  ;;  %p1978_p12 = pneg %p1977_p3 }
 0x3d9   : > { %p1983_p10 = pnand %p1982_p8, %p1978_p12 }
 0x3dd   : > { %v1598_v41 = vpop.eup %1597 }
 0x3de   : > { %v788_v42 = vmul.f32 %v1598_v41, %v786_v39  ;;  %vm794_vm14 = vweird.f32 %v1598_v41 }
 0x3df   : > { %vm795_vm15 = vmor %vm793_vm13, %vm794_vm14 }
 0x3e0   : > { %v789_v43 = vmul.f32 %v1598_v41, %v788_v42 }
 0x3e2   : > { %v790_v45 = vmul.f32 0.5, %v789_v43 }
 0x3e4   : > { %v791_v47 = vsub.f32 1.5, %v790_v45 }
 0x3e6   : > { %v792_v48 = vmul.f32 %v1598_v41, %v791_v47 }
 0x3e8   : > { %v796_v49 = vsel %vm795_vm15, %v1598_v41, %v792_v48 }
 0x3e9   : > { %v798_v50 = vmul.f32 %v796_v49, %v777_v30  ;;  %v797_v60 = vmul.f32 %v796_v49, %v786_v39 }
 0x3eb   : > { %1165 = vmatpush.msra.mxu0 %v798_v50 }
 0x3ec   : > { %1420 = vmatmul.msk.f32.vlgmr.msra.gmra.mxu0 %vm1035_vm9, %v1146_v51 }
 0x43c   : > { %v1023_v1 = vpop.permute.xlu0 %1022 }
 0x43d   : > { %v1026_v2 = vsel %vm1025_vm10, 0.0, %v1023_v1 }
 0x43e   : > { %v1030_v3 = vmul.f32 %v1589_v0, %v1026_v2 }
 0x440   : > { %1077 = vmatpush.msrb.mxu3 %v1030_v3 }
 0x441   : > { %1417 = vmatmul.msk.f32.vlgmr.msrb.gmra.mxu3 %vm1035_vm9, %v1018_v4 }
 0x442   : > { %1134 = vmatpush.msra.mxu3 %v1122_v5 }
 0x444   : > { %v1083_v8 = vpop.permute.xlu0 %1082  ;;  %1135 = vmatpush.msra.mxu3 %v1121_v6 }
 0x445   : > { %v1086_v9 = vsel %vm1085_vm11, %v1083_v8, 0.0 }
 0x446   : > { %v1090_v10 = vmul.f32 %v1590_v7, %v1086_v9  ;;  %1136 = vmatpush.msra.mxu3 %v1120_v20 }
 0x448   : > { %1109 = vmatpush.msra.mxu2 %v1090_v10  ;;  %1137 = vmatpush.msra.mxu3 %v1119_v21 }
 0x449   : > { %1418 = vmatmul.msk.f32.vlgmr.msra.gmra.mxu2 %vm1035_vm9, %v1020_v11 }
 0x44a   : > { %1138 = vmatpush.msra.mxu3 %v1118_v24 }
 0x44c   : > { %1139 = vmatpush.msra.mxu3 %v1117_v40 }
 0x44e   : > { %1140 = vmatpush.msra.mxu3 %v1116_v44 }
 0x450   : > { %1141 = vmatpush.msra.mxu3 %v1115_v46  ;;  %v1056_v52 = vpop.f32.mrf.mxu2 }
 0x469   : > { %v1167_v57 = vpop.f32.mrf.mxu0 }
 0x4c4   : > { %v1079_v53 = vpop.f32.mrf.mxu3 }
 0x4c5   : > { %v1080_v54 = vadd.f32 %v1079_v53, %v1056_v52 }
 0x4cc   : > { %v1111_v55 = vpop.f32.mrf.mxu2 }
 0x4cd   : > { %v1114_v56 = vadd.f32 %v1111_v55, %v1080_v54 }
 0x4cf   : > { %1419 = vmatmul.msk.f32.vlgmr.msra.gmra.mxu3 %vm944_vm5, %v1114_v56 }
 0x552   : > { %v1143_v58 = vpop.f32.mrf.mxu3 }
 0x553   : > { %v1168_v61 = vadd.f32 %v1167_v57, %v1143_v58 }
 0x555   : > { %v1171_v62 = vadd.f32 %v1170_v59, %v1168_v61 }
 0x557   : > { %v1172_v63 = vmul.f32 %v1171_v62, %v797_v60 }
 0x559   : > { %v1173_v0 = vadd.f32 %v1172_v63, %v776_v29 }
 0x55b   : > { %1174 = vst [vmem:[%s761_s5] sm:$0xff] %v1173_v0 }
 0x55c   : > { %1986 = shalt.err (!%p1983_p10)
}
 0x55d   : > { %1469 = dma.vmem_to_hbm [thread:$0]  (%p2295_p4), %s1189_s15, 128, %s1191_s20, %s1176_s1  }
 0x55e PF: > { %s1202_s14 = sand.u32 1, %s2041_s24   ;;  %p2521_p11 = scmp.ge.s32.totalorder %s2053_s27, 2 }
 0x55f   : > { %s1203_s17 = scalar_lea.sflag [#allocation4], %s1202_s14 }
 0x560   : > { %p1510_p5 = pnand %p2521_p11, %p2299_p6 }
 0x562   : > { %p1511_p13 = pneg %p1510_p5 }
 0x564   : > { %2036 = dma.done.wait (%p1511_p13), %s1203_s17, 128  }
 0x565   : > { %2038 = vsyncadd (%p1511_p13), %s1203_s17, 4294967168  ;;  %s2522_s27 = sld [smem:[#allocation33_spill]]  ;;  %s2525_s24 = smov %s2045_s25 }
 0x566   : > { %s2523_s26 = sld [smem:[#allocation32_spill]] }
 0x567   : > { %s2524_s18 = sld [smem:[#allocation34_spill]] }
 0x56b   : > { %p38_p0 = scmp.ge.s32.totalorder %s2522_s27, 4  }
 0x56c   : > { %s2526_s25 = smov %s2523_s26 }
 0x56d   : > { %s2527_s26 = smov %s2524_s18  ;;  %40 = sbr.rel (!%p38_p0) target bundleno = 28 (0x1c), region = 186 }
 0x572   :  { %1209 = vsyncpa [#allocation3], 1 }
 0x573   :  { %1211 = vsyncpa [#allocation3 + $0x1], 1 }
 0x574   :  { %1212 = vsyncpa [#allocation6], 1 }
 0x575   :  { %1214 = vsyncpa [#allocation6 + $0x1], 1 }
 0x576   :  { %1215 = vsyncpa [#allocation9], 1 }
 0x577   :  { %1216 = vsyncpa [#allocation12], 1 }
 0x578   :  { %1217 = vsyncpa [#allocation15], 1 }
 0x579   :  { %1218 = vsyncpa [#allocation18], 1 }
 0x57a   :  { %1219 = vsyncpa [#allocation21], 1 }
 0x57b   :  { %1220 = vsyncpa [#allocation4], 1 }
 0x57c   :  { %1222 = vsyncpa [#allocation4 + $0x1], 1 }

</bundles_post_ra>
